<compile_context>
chip_gen: v7x
topology: tpu7x:2x2x1
jax: 0.10.0
libtpu: 0.0.40
codegen_flags: <defaults>
</compile_context>

<pallas_src>
import math

import jax
import jax.numpy as jnp
from jax import lax
from jax.experimental import pallas as pl
from jax.experimental.pallas import tpu as pltpu

_LANE = 128
_LN2 = math.log(2.0)                         # bce element value at (x=0, t=0)
_P2_AT_ZERO = 1.0 / (1.0 + math.exp(-0.5))   # sigmoid(sigmoid(0)) at padded cols


def _round_up(x, m):
    return (x + m - 1) // m * m


def _balanced_tile(total, cap, align):
    """Tile ~ total / ceil(total/cap), rounded up to `align` (soft cap).

    Keeps padding below ~one `align` unit per tile instead of up to ~2x work
    from rounding `total` straight up to a fixed cap."""
    cap = max(int(cap), align)
    nblk = max(1, -(-total // cap))
    tile = _round_up(-(-total // nblk), align)
    return min(tile, _round_up(total, align))


def _vmem_capacity_bytes():
    """Per-TensorCore VMEM; conservative fallback = 64 MiB (v7x, the smallest)."""
    try:
        cap = getattr(pltpu.get_tpu_info(), "vmem_capacity_bytes", None)
        if cap:
            return int(cap)
    except Exception:
        pass
    return 64 * 1024 * 1024


def _make_kernel(smooth, pad_cols, thw, tr):
    n_slices = thw // _LANE
    bce_fix = float(pad_cols) * _LN2
    den_fix = float(pad_cols) * _P2_AT_ZERO

    def lane_fold(v):
        # (tr, thw) -> (tr, 128) partial sum using lane-aligned 128-wide slices
        # and VALU adds only; the cross-lane XLU reduce happens once per tile.
        r = v[:, 0:_LANE]
        for c in range(1, n_slices):
            r = r + v[:, c * _LANE:(c + 1) * _LANE]
        return r

    def kernel(x_ref, t_ref, out_ref, bce_acc, inter_acc, denom_acc):
        k = pl.program_id(1)

        @pl.when(k == 0)
        def _():
            bce_acc[...] = jnp.zeros_like(bce_acc)
            inter_acc[...] = jnp.zeros_like(inter_acc)
            denom_acc[...] = jnp.zeros_like(denom_acc)

        x = x_ref[...].astype(jnp.float32)
        t = t_ref[...].astype(jnp.float32)

        # tanh-based sigmoid/softplus: 3 EUP pushes per element (tanh, log1p,
        # tanh) instead of 2 exp + 1 log + 2 divides, and no sign select.
        th = jnp.tanh(0.5 * x)
        # log1p(exp(-|x|)) == log(2) - log1p(|tanh(x/2)|)
        softplus = _LN2 - jnp.log1p(jnp.abs(th))
        bce_elt = jnp.maximum(x, 0.0) - x * t + softplus

        p1 = 0.5 * (1.0 + th)                    # sigmoid(x)
        p2 = 0.5 * (1.0 + jnp.tanh(0.5 * p1))    # sigmoid(sigmoid(x)) — faithful
                                                 # to the PyTorch double sigmoid.

        bce_acc[...] += lane_fold(bce_elt)
        inter_acc[...] += lane_fold(p2 * t)      # padded cols have t == 0
        denom_acc[...] += lane_fold(p2 + t)

        @pl.when(k == pl.num_programs(1) - 1)
        def _():
            # Padded columns are (x=0, t=0): each contributes exactly log(2) to
            # the bce row sum and sigmoid(sigmoid(0)) to the Dice denominator.
            # Subtract those compile-time constants instead of masking per step.
            bce_row = jnp.sum(bce_acc[...], axis=-1, keepdims=True) - bce_fix
            inter = jnp.sum(inter_acc[...], axis=-1, keepdims=True)
            denom = jnp.sum(denom_acc[...], axis=-1, keepdims=True) - den_fix
            dice_row = 1.0 - (2.0 * inter + smooth) / (denom + smooth)
            col = lax.broadcasted_iota(jnp.int32, (tr, 2), 1)
            out_ref[...] = jnp.where(col == 0, bce_row, dice_row)

    return kernel


def combined_loss(predictions, targets, bce_weight=0.5, smooth=1.0,
                  compute_dtype=None):
    """predictions, targets: [B, C, H, W] (NCHW). Returns the scalar loss.

    compute_dtype: optionally cast inputs (e.g. jnp.bfloat16) before the kernel
    to halve HBM traffic on v5e/v6e; the kernel always computes in f32.
    """
    B, C, H, W = predictions.shape
    BC, HW = B * C, H * W

    if compute_dtype is not None:
        predictions = predictions.astype(compute_dtype)
        targets = targets.astype(compute_dtype)
    dtype = jnp.promote_types(predictions.dtype, targets.dtype)
    x = predictions.reshape(BC, HW).astype(dtype)
    t = targets.reshape(BC, HW).astype(dtype)
    ebytes = jnp.dtype(dtype).itemsize

    # Sublane alignment: 8 rows for 4-byte dtypes, 16 for 2-byte (bf16 packing).
    row_align = 8 if ebytes >= 4 else 16

    # --- per-input block budget ---------------------------------------------
    # ~70% of physical VMEM must cover 2 inputs x 2 pipeline buffers plus the
    # ~8-10 live f32 element-wise temporaries of a block -> budget/14 per
    # f32-equivalent block: v7x (64 MiB) -> ~3 MiB, v5e/v6e (128 MiB) -> ~6 MiB.
    # Big enough that the ~0.35 us/step overhead stays a small fraction of the
    # per-step HBM time on every generation.
    vmem_budget = int(0.70 * _vmem_capacity_bytes())
    blk_f32 = min(8 << 20, max(2 << 20, vmem_budget // 14))
    blk_elems = blk_f32 // 4

    # --- balanced tiling ------------------------------------------------------
    thw_max = 8192                 # bounds the in-kernel lane-fold unroll (<=64)
    tr_full = min(_round_up(BC, row_align), 1024)
    thw_cap = max(512, min(thw_max, (blk_elems // tr_full) // _LANE * _LANE))
    THW = _balanced_tile(HW, thw_cap, _LANE)
    tr_budget = max(row_align, (blk_elems // THW) // row_align * row_align)
    TR = _balanced_tile(BC, tr_budget, row_align)

    # Megacore (v7x): give the "parallel" row axis >= 2 tiles, but only if each
    # half still moves >= 2 MiB/step and BC is not tiny (on single-TC parts the
    # split is ~neutral, so never shrink blocks below the amortization point).
    if -(-BC // TR) < 2 and BC >= 2 * row_align:
        half = _round_up(-(-BC // 2), row_align)
        if half * THW * ebytes >= (2 << 20):
            TR = half

    HW_pad = _round_up(HW, THW)
    R = _round_up(BC, TR)
    pad_r, pad_c = R - BC, HW_pad - HW
    if pad_r or pad_c:
        x = jnp.pad(x, ((0, pad_r), (0, pad_c)))
        t = jnp.pad(t, ((0, pad_r), (0, pad_c)))

    grid = (R // TR, HW_pad // THW)
    in_spec = pl.BlockSpec((TR, THW), lambda i, k: (i, k))
    out_spec = pl.BlockSpec((TR, 2), lambda i, k: (i, 0))

    kernel = _make_kernel(float(smooth), pad_c, THW, TR)

    rows = pl.pallas_call(
        kernel,
        out_shape=jax.ShapeDtypeStruct((R, 2), jnp.float32),
        grid=grid,
        in_specs=[in_spec, in_spec],
        out_specs=out_spec,
        scratch_shapes=[pltpu.VMEM((TR, _LANE), jnp.float32),
                        pltpu.VMEM((TR, _LANE), jnp.float32),
                        pltpu.VMEM((TR, _LANE), jnp.float32)],
        compiler_params=pltpu.CompilerParams(
            dimension_semantics=("parallel", "arbitrary"),
            vmem_limit_bytes=int(vmem_budget)),
    )(x, t)

    # Drop padded rows; the tiny final reductions stay in plain JAX glue.
    bce_rows = rows[:BC, 0]
    dice_rows = rows[:BC, 1]
    bce = jnp.sum(bce_rows) / (BC * HW)     # mean over all elements
    dice = jnp.mean(dice_rows)              # mean over (B, C)
    return bce * bce_weight + dice * (1.0 - bce_weight)


def _reference(predictions, targets, bce_weight=0.5, smooth=1.0):
    x = predictions.astype(jnp.float32)
    t = targets.astype(jnp.float32)
    bce = jnp.mean(jnp.maximum(x, 0.0) - x * t + jnp.log1p(jnp.exp(-jnp.abs(x))))
    p = jax.nn.sigmoid(jax.nn.sigmoid(x))   # double sigmoid, as in the PyTorch code
    inter = jnp.sum(p * t, axis=(2, 3))
    dice = jnp.mean(
        1.0 - (2.0 * inter + smooth)
        / (jnp.sum(p, axis=(2, 3)) + jnp.sum(t, axis=(2, 3)) + smooth))
    return bce * bce_weight + dice * (1.0 - bce_weight)


if __name__ == "__main__":
    key = jax.random.PRNGKey(0)
    k1, k2 = jax.random.split(key)
    B, C, H, W = 2, 4, 16, 16
    predictions = jax.random.normal(k1, (B, C, H, W), dtype=jnp.float32)
    targets = jax.random.bernoulli(k2, 0.5, (B, C, H, W)).astype(jnp.float32)

    ref = _reference(predictions, targets, bce_weight=0.5, smooth=1.0)

    loss = combined_loss(predictions, targets, bce_weight=0.5, smooth=1.0)
    loss = jax.block_until_ready(loss)
    assert jnp.allclose(loss, ref, atol=1e-5, rtol=1e-5), (loss, ref)

    # bf16-input path (halves HBM traffic on v5e/v6e); loose tolerance because
    # the inputs themselves are rounded to bf16 before the kernel.
    loss_bf16 = combined_loss(predictions, targets, bce_weight=0.5, smooth=1.0,
                              compute_dtype=jnp.bfloat16)
    loss_bf16 = jax.block_until_ready(loss_bf16)
    assert jnp.allclose(loss_bf16, ref, atol=5e-2, rtol=5e-2), (loss_bf16, ref)

    print("KERNEL_OK")
</pallas_src>

<mosaic_0001>
module attributes {stable_mosaic.version = 11 : i64} {
  func.func @kernel(%arg0: i32, %arg1: i32, %arg2: memref<8x256xf32, #tpu.memory_space<vmem>>, %arg3: memref<8x256xf32, #tpu.memory_space<vmem>>, %arg4: memref<8x2xf32, #tpu.memory_space<vmem>>, %arg5: memref<8x128xf32, #tpu.memory_space<vmem>>, %arg6: memref<8x128xf32, #tpu.memory_space<vmem>>, %arg7: memref<8x128xf32, #tpu.memory_space<vmem>>) attributes {dimension_semantics = [#tpu.dimension_semantics<parallel>, #tpu.dimension_semantics<arbitrary>], iteration_bounds = array<i64: 1, 1>, scalar_prefetch = 0 : i64, scratch_operands = 3 : i64, tpu.core_type = #tpu.core_type<tc>, window_params = [{transform_indices = @transform_0, window_bounds = array<i64: 8, 256>}, {transform_indices = @transform_1, window_bounds = array<i64: 8, 256>}, {transform_indices = @transform_2, window_bounds = array<i64: 8, 2>}]} {
    %c0_i32 = arith.constant 0 : i32
    %0 = arith.cmpi eq, %arg1, %c0_i32 : i32
    %1 = arith.extui %0 : i1 to i32
    %c0_i32_0 = arith.constant 0 : i32
    %2 = arith.cmpi ne, %1, %c0_i32_0 : i32
    scf.if %2 {
      %cst_25 = arith.constant 0.000000e+00 : f32
      %51 = vector.broadcast %cst_25 : f32 to vector<8x128xf32>
      %c0_26 = arith.constant 0 : index
      %c0_27 = arith.constant 0 : index
      %52 = vector.load %arg5[%c0_26, %c0_27] : memref<8x128xf32, #tpu.memory_space<vmem>>, vector<8x128xf32>
      tpu.vector_store %arg5[%c0_26, %c0_27], %51 {strides = array<i32>} : memref<8x128xf32, #tpu.memory_space<vmem>>, vector<8x128xf32>,
      %cst_28 = arith.constant 0.000000e+00 : f32
      %53 = vector.broadcast %cst_28 : f32 to vector<8x128xf32>
      %c0_29 = arith.constant 0 : index
      %c0_30 = arith.constant 0 : index
      %54 = vector.load %arg6[%c0_29, %c0_30] : memref<8x128xf32, #tpu.memory_space<vmem>>, vector<8x128xf32>
      tpu.vector_store %arg6[%c0_29, %c0_30], %53 {strides = array<i32>} : memref<8x128xf32, #tpu.memory_space<vmem>>, vector<8x128xf32>,
      %cst_31 = arith.constant 0.000000e+00 : f32
      %55 = vector.broadcast %cst_31 : f32 to vector<8x128xf32>
      %c0_32 = arith.constant 0 : index
      %c0_33 = arith.constant 0 : index
      %56 = vector.load %arg7[%c0_32, %c0_33] : memref<8x128xf32, #tpu.memory_space<vmem>>, vector<8x128xf32>
      tpu.vector_store %arg7[%c0_32, %c0_33], %55 {strides = array<i32>} : memref<8x128xf32, #tpu.memory_space<vmem>>, vector<8x128xf32>,
    } else {
    }
    %c0 = arith.constant 0 : index
    %c0_1 = arith.constant 0 : index
    %3 = vector.load %arg2[%c0, %c0_1] : memref<8x256xf32, #tpu.memory_space<vmem>>, vector<8x256xf32>
    %c0_2 = arith.constant 0 : index
    %c0_3 = arith.constant 0 : index
    %4 = vector.load %arg3[%c0_2, %c0_3] : memref<8x256xf32, #tpu.memory_space<vmem>>, vector<8x256xf32>
    %cst = arith.constant 5.000000e-01 : f32
    %5 = vector.broadcast %cst : f32 to vector<8x256xf32>
    %6 = arith.mulf %5, %3 : vector<8x256xf32>
    %7 = math.tanh %6 : vector<8x256xf32>
    %8 = math.absf %7 : vector<8x256xf32>
    %9 = math.log1p %8 : vector<8x256xf32>
    %cst_4 = arith.constant 0.693147182 : f32
    %10 = vector.broadcast %cst_4 : f32 to vector<8x256xf32>
    %11 = arith.subf %10, %9 : vector<8x256xf32>
    %cst_5 = arith.constant 0.000000e+00 : f32
    %12 = vector.broadcast %cst_5 : f32 to vector<8x256xf32>
    %13 = arith.maximumf %3, %12 : vector<8x256xf32>
    %14 = arith.mulf %3, %4 : vector<8x256xf32>
    %15 = arith.subf %13, %14 : vector<8x256xf32>
    %16 = arith.addf %15, %11 : vector<8x256xf32>
    %cst_6 = arith.constant 1.000000e+00 : f32
    %17 = vector.broadcast %cst_6 : f32 to vector<8x256xf32>
    %18 = arith.addf %17, %7 : vector<8x256xf32>
    %cst_7 = arith.constant 5.000000e-01 : f32
    %19 = vector.broadcast %cst_7 : f32 to vector<8x256xf32>
    %20 = arith.mulf %19, %18 : vector<8x256xf32>
    %cst_8 = arith.constant 5.000000e-01 : f32
    %21 = vector.broadcast %cst_8 : f32 to vector<8x256xf32>
    %22 = arith.mulf %21, %20 : vector<8x256xf32>
    %23 = math.tanh %22 : vector<8x256xf32>
    %cst_9 = arith.constant 1.000000e+00 : f32
    %24 = vector.broadcast %cst_9 : f32 to vector<8x256xf32>
    %25 = arith.addf %24, %23 : vector<8x256xf32>
    %cst_10 = arith.constant 5.000000e-01 : f32
    %26 = vector.broadcast %cst_10 : f32 to vector<8x256xf32>
    %27 = arith.mulf %26, %25 : vector<8x256xf32>
    %c0_11 = arith.constant 0 : index
    %c0_12 = arith.constant 0 : index
    %28 = vector.load %arg5[%c0_11, %c0_12] : memref<8x128xf32, #tpu.memory_space<vmem>>, vector<8x128xf32>
    %29 = vector.extract_strided_slice %16 {offsets = [0, 0], sizes = [8, 128], strides = [1, 1]} : vector<8x256xf32> to vector<8x128xf32>
    %30 = vector.extract_strided_slice %16 {offsets = [0, 128], sizes = [8, 128], strides = [1, 1]} : vector<8x256xf32> to vector<8x128xf32>
    %31 = arith.addf %29, %30 : vector<8x128xf32>
    %32 = arith.addf %28, %31 : vector<8x128xf32>
    %c0_13 = arith.constant 0 : index
    %c0_14 = arith.constant 0 : index
    %33 = vector.load %arg5[%c0_13, %c0_14] : memref<8x128xf32, #tpu.memory_space<vmem>>, vector<8x128xf32>
    tpu.vector_store %arg5[%c0_13, %c0_14], %32 {strides = array<i32>} : memref<8x128xf32, #tpu.memory_space<vmem>>, vector<8x128xf32>,
    %c0_15 = arith.constant 0 : index
    %c0_16 = arith.constant 0 : index
    %34 = vector.load %arg6[%c0_15, %c0_16] : memref<8x128xf32, #tpu.memory_space<vmem>>, vector<8x128xf32>
    %35 = arith.mulf %27, %4 : vector<8x256xf32>
    %36 = vector.extract_strided_slice %35 {offsets = [0, 0], sizes = [8, 128], strides = [1, 1]} : vector<8x256xf32> to vector<8x128xf32>
    %37 = vector.extract_strided_slice %35 {offsets = [0, 128], sizes = [8, 128], strides = [1, 1]} : vector<8x256xf32> to vector<8x128xf32>
    %38 = arith.addf %36, %37 : vector<8x128xf32>
    %39 = arith.addf %34, %38 : vector<8x128xf32>
    %c0_17 = arith.constant 0 : index
    %c0_18 = arith.constant 0 : index
    %40 = vector.load %arg6[%c0_17, %c0_18] : memref<8x128xf32, #tpu.memory_space<vmem>>, vector<8x128xf32>
    tpu.vector_store %arg6[%c0_17, %c0_18], %39 {strides = array<i32>} : memref<8x128xf32, #tpu.memory_space<vmem>>, vector<8x128xf32>,
    %c0_19 = arith.constant 0 : index
    %c0_20 = arith.constant 0 : index
    %41 = vector.load %arg7[%c0_19, %c0_20] : memref<8x128xf32, #tpu.memory_space<vmem>>, vector<8x128xf32>
    %42 = arith.addf %27, %4 : vector<8x256xf32>
    %43 = vector.extract_strided_slice %42 {offsets = [0, 0], sizes = [8, 128], strides = [1, 1]} : vector<8x256xf32> to vector<8x128xf32>
    %44 = vector.extract_strided_slice %42 {offsets = [0, 128], sizes = [8, 128], strides = [1, 1]} : vector<8x256xf32> to vector<8x128xf32>
    %45 = arith.addf %43, %44 : vector<8x128xf32>
    %46 = arith.addf %41, %45 : vector<8x128xf32>
    %c0_21 = arith.constant 0 : index
    %c0_22 = arith.constant 0 : index
    %47 = vector.load %arg7[%c0_21, %c0_22] : memref<8x128xf32, #tpu.memory_space<vmem>>, vector<8x128xf32>
    tpu.vector_store %arg7[%c0_21, %c0_22], %46 {strides = array<i32>} : memref<8x128xf32, #tpu.memory_space<vmem>>, vector<8x128xf32>,
    %c0_i32_23 = arith.constant 0 : i32
    %48 = arith.cmpi eq, %arg1, %c0_i32_23 : i32
    %49 = arith.extui %48 : i1 to i32
    %c0_i32_24 = arith.constant 0 : i32
    %50 = arith.cmpi ne, %49, %c0_i32_24 : i32
    scf.if %50 {
      %c0_25 = arith.constant 0 : index
      %c0_26 = arith.constant 0 : index
      %51 = vector.load %arg5[%c0_25, %c0_26] : memref<8x128xf32, #tpu.memory_space<vmem>>, vector<8x128xf32>
      %cst_27 = arith.constant dense<0.000000e+00> : vector<8xf32>
      %52 = vector.multi_reduction <add>, %51, %cst_27 [1] : vector<8x128xf32> to vector<8xf32>
      %53 = vector.shape_cast %52 : vector<8xf32> to vector<8x1xf32>
      %cst_28 = arith.constant 0.000000e+00 : f32
      %54 = vector.broadcast %cst_28 : f32 to vector<8x1xf32>
      %55 = arith.subf %53, %54 : vector<8x1xf32>
      %c0_29 = arith.constant 0 : index
      %c0_30 = arith.constant 0 : index
      %56 = vector.load %arg6[%c0_29, %c0_30] : memref<8x128xf32, #tpu.memory_space<vmem>>, vector<8x128xf32>
      %cst_31 = arith.constant dense<0.000000e+00> : vector<8xf32>
      %57 = vector.multi_reduction <add>, %56, %cst_31 [1] : vector<8x128xf32> to vector<8xf32>
      %58 = vector.shape_cast %57 : vector<8xf32> to vector<8x1xf32>
      %c0_32 = arith.constant 0 : index
      %c0_33 = arith.constant 0 : index
      %59 = vector.load %arg7[%c0_32, %c0_33] : memref<8x128xf32, #tpu.memory_space<vmem>>, vector<8x128xf32>
      %cst_34 = arith.constant dense<0.000000e+00> : vector<8xf32>
      %60 = vector.multi_reduction <add>, %59, %cst_34 [1] : vector<8x128xf32> to vector<8xf32>
      %61 = vector.shape_cast %60 : vector<8xf32> to vector<8x1xf32>
      %cst_35 = arith.constant 0.000000e+00 : f32
      %62 = vector.broadcast %cst_35 : f32 to vector<8x1xf32>
      %63 = arith.subf %61, %62 : vector<8x1xf32>
      %cst_36 = arith.constant 2.000000e+00 : f32
      %64 = vector.broadcast %cst_36 : f32 to vector<8x1xf32>
      %65 = arith.mulf %64, %58 : vector<8x1xf32>
      %cst_37 = arith.constant 1.000000e+00 : f32
      %66 = vector.broadcast %cst_37 : f32 to vector<8x1xf32>
      %67 = arith.addf %65, %66 : vector<8x1xf32>
      %cst_38 = arith.constant 1.000000e+00 : f32
      %68 = vector.broadcast %cst_38 : f32 to vector<8x1xf32>
      %69 = arith.addf %63, %68 : vector<8x1xf32>
      %70 = arith.divf %67, %69 : vector<8x1xf32>
      %cst_39 = arith.constant 1.000000e+00 : f32
      %71 = vector.broadcast %cst_39 : f32 to vector<8x1xf32>
      %72 = arith.subf %71, %70 : vector<8x1xf32>
      %73 = tpu.iota {dimensions = array<i32: 1>} : vector<8x2xi32>
      %c0_i32_40 = arith.constant 0 : i32
      %74 = vector.broadcast %c0_i32_40 : i32 to vector<8x2xi32>
      %75 = arith.cmpi eq, %73, %74 : vector<8x2xi32>
      %76 = vector.shape_cast %55 : vector<8x1xf32> to vector<8x1xf32>
      %77 = vector.broadcast %76 : vector<8x1xf32> to vector<8x2xf32>
      %78 = vector.shape_cast %72 : vector<8x1xf32> to vector<8x1xf32>
      %79 = vector.broadcast %78 : vector<8x1xf32> to vector<8x2xf32>
      %80 = arith.select %75, %77, %79 : vector<8x2xi1>, vector<8x2xf32>
      %c0_41 = arith.constant 0 : index
      %c0_42 = arith.constant 0 : index
      %81 = vector.load %arg4[%c0_41, %c0_42] : memref<8x2xf32, #tpu.memory_space<vmem>>, vector<8x2xf32>
      tpu.vector_store %arg4[%c0_41, %c0_42], %80 {strides = array<i32>} : memref<8x2xf32, #tpu.memory_space<vmem>>, vector<8x2xf32>,
    } else {
    }
    return
  }
  func.func @transform_0(%arg0: i32, %arg1: i32) -> (i32, i32) {
    %c0_i32 = arith.constant 0 : i32
    return %arg0, %arg1 : i32, i32
  }
  func.func @transform_1(%arg0: i32, %arg1: i32) -> (i32, i32) {
    %c0_i32 = arith.constant 0 : i32
    return %arg0, %arg1 : i32, i32
  }
  func.func @transform_2(%arg0: i32, %arg1: i32) -> (i32, i32) {
    %c0_i32 = arith.constant 0 : i32
    %c0_i32_0 = arith.constant 0 : i32
    return %arg0, %c0_i32 : i32, i32
  }
}

</mosaic_0001>

<bundles_post_ra>
// kernel: tpu_custom_call.1
= control target key start
LH: loop header
LB: loop body
LE: loop exit
PB: predicated region body
PF: predicated region fallthrough
CT: control target
= control target key end

     0   :  { %7 = vsyncpa [#allocation6], 0  ;;  %s246_s0 = inlined_call_operand.hbm [shape: f32[8,256], index: 0, kind: input, shape index: {}]   ;;  %s247_s1 = inlined_call_operand.hbm [shape: f32[8,256], index: 1, kind: input, shape index: {}]   ;;  %s248_s2 = inlined_call_operand.vmem [shape: f32[8,2], index: 2, kind: output, shape index: {}]  }
   0x1   :  { %8 = vsyncpa [#allocation8], 0  ;;  %s202_s9 = smov [#allocation5]   ;;  %s203_s11 = smov [#allocation7]  }
   0x2   :  { %s15_s10 = sshll.u32 %s202_s9, 4  ;;  %s25_s12 = sshll.u32 %s203_s11, 4  ;;  %s16_s10 = int_to_ptr.vmem [resolvable:$true] %s15_s10  ;;  %s26_s12 = int_to_ptr.vmem [resolvable:$true] %s25_s12 }
   0x3   :  { %s154_s15 = scalar_lea.hbm %s246_s0, 256 }
   0x4   :  { %p155_p0 = scmp.ne.s32.totalorder %s246_s0, %s154_s15  ;;  %p158_p1 = scmp.lt.u32.totalorder %s154_s15, %s246_s0 }
   0x6   :  { %p160_p2 = pnand %p158_p1, %p155_p0 }
   0x8   :  { %163 = shalt.err (!%p160_p2)
}
   0x9   :  { %s164_s20 = scalar_lea.vmem %s16_s10, 256  ;;  %p169_p4 = scmp.lt.s32.totalorder %s16_s10, %s16_s10 }
   0xa   :  { %p165_p3 = scmp.ne.s32.totalorder %s16_s10, %s164_s20  ;;  %p170_p5 = scmp.lt.s32.totalorder %s164_s20, %s164_s20 }
   0xc   :  { %p171_p6 = por %p170_p5, %p169_p4 }
   0xe   :  { %p172_p7 = pnand %p171_p6, %p165_p3 }
  0x10   :  { %175 = shalt.err (!%p172_p7)
}
  0x11   :  { %18 = dma.hbm_to_vmem [thread:$0]  %s246_s0, 256, %s16_s10, [#allocation6]  }
  0x12   :  { %s176_s25 = scalar_lea.hbm %s247_s1, 256 }
  0x13   :  { %p177_p8 = scmp.ne.s32.totalorder %s247_s1, %s176_s25  ;;  %p180_p9 = scmp.lt.u32.totalorder %s176_s25, %s247_s1 }
  0x15   :  { %p182_p10 = pnand %p180_p9, %p177_p8 }
  0x17   :  { %185 = shalt.err (!%p182_p10)
}
  0x18   :  { %s186_s30 = scalar_lea.vmem %s26_s12, 256  ;;  %p191_p12 = scmp.lt.s32.totalorder %s26_s12, %s26_s12 }
  0x19   :  { %p187_p11 = scmp.ne.s32.totalorder %s26_s12, %s186_s30  ;;  %p192_p13 = scmp.lt.s32.totalorder %s186_s30, %s186_s30 }
  0x1b   :  { %p193_p0 = por %p192_p13, %p191_p12 }
  0x1d   :  { %p194_p1 = pnand %p193_p0, %p187_p11 }
  0x1f   :  { %197 = shalt.err (!%p194_p1)
}
  0x20   :  { %28 = dma.hbm_to_vmem [thread:$0]  %s247_s1, 256, %s26_s12, [#allocation8]  }
  0x21   :  { %198 = dma.done.wait [#allocation6], 256  }
  0x22   :  { %199 = vsyncadd [#allocation6], 4294967040 }
  0x23   :  { %200 = dma.done.wait [#allocation8], 256  }
  0x24   :  { %201 = vsyncadd [#allocation8], 4294967040  ;;  %v42_v0 = vld [vmem:[#allocation5] sm:$0xff]  ;;  %v43_v1 = vld [vmem:[#allocation5 + $0x8] sm:$0xff]  ;;  %v126_v57 = vlaneseq  ;;  %vm130_vm3 = vcmask 15360  }
  0x25   :  { %v46_v2 = vmul.f32 0.5, %v42_v0  ;;  %v47_v3 = vmul.f32 0.5, %v43_v1  ;;  %v44_v20 = vld [vmem:[#allocation7] sm:$0xff]  ;;  %v45_v21 = vld [vmem:[#allocation7 + $0x8] sm:$0xff]  ;;  %v72_v22 = vmax.f32 %v42_v0, 0.0  ;;  %v73_v25 = vmax.f32 %v43_v1, 0.0 }
  0x26   :  { %v74_v23 = vmul.f32 %v44_v20, %v42_v0  ;;  %v75_v26 = vmul.f32 %v45_v21, %v43_v1  ;;  %v127_v59 = vand.u32 127, %v126_v57 }
  0x27   :  { %140 = vtanh.f32 %v46_v2 }
  0x28   :  { %142 = vtanh.f32 %v47_v3  ;;  %v76_v33 = vsub.f32 %v72_v22, %v74_v23  ;;  %v77_v37 = vsub.f32 %v73_v25, %v75_v26  ;;  %vm128_vm2 = vcmp.eq.s32.totalorder %v127_v59, 0 }
  0x31   :  { %v141_v4 = vpop.eup %140 }
  0x32   :  { %v143_v5 = vpop.eup %142  ;;  %v80_v6 = vadd.f32 1.0, %v141_v4  ;;  %v50_v7 = vand.u32 2147483647, %v141_v4 }
  0x33   :  { %v81_v8 = vadd.f32 1.0, %v143_v5  ;;  %v51_v9 = vand.u32 2147483647, %v143_v5 }
  0x34   :  { %v82_v10 = vmul.f32 0.5, %v80_v6  ;;  %v52_v11 = vadd.f32 1.0, %v50_v7  ;;  %v55_v16 = vmul.f32 -0.5, %v50_v7  ;;  %vm59_vm0 = vcmp.lt.f32.partialorder %v50_v7, 0.0004427343 }
  0x35   :  { %v83_v12 = vmul.f32 0.5, %v81_v8  ;;  %v61_v13 = vadd.f32 1.0, %v51_v9  ;;  %v64_v17 = vmul.f32 -0.5, %v51_v9  ;;  %vm68_vm1 = vcmp.lt.f32.partialorder %v51_v9, 0.0004427343 }
  0x36   :  { %v84_v14 = vmul.f32 0.5, %v82_v10  ;;  %144 = vlog2.f32 %v52_v11  ;;  %v56_v18 = vadd.f32 1.0, %v55_v16 }
  0x37   :  { %v85_v15 = vmul.f32 0.5, %v83_v12  ;;  %146 = vlog2.f32 %v61_v13  ;;  %v65_v19 = vadd.f32 1.0, %v64_v17 }
  0x38   :  { %148 = vtanh.f32 %v84_v14  ;;  %v57_v24 = vmul.f32 %v56_v18, %v50_v7 }
  0x39   :  { %150 = vtanh.f32 %v85_v15  ;;  %v66_v28 = vmul.f32 %v65_v19, %v51_v9 }
  0x40   :  { %v145_v27 = vpop.eup %144 }
  0x41   :  { %v147_v29 = vpop.eup %146  ;;  %v54_v30 = vmul.f32 0.6931472, %v145_v27 }
  0x42   :  { %v149_v31 = vpop.eup %148  ;;  %v63_v32 = vmul.f32 0.6931472, %v147_v29 }
  0x43   :  { %v151_v34 = vpop.eup %150  ;;  %v88_v35 = vadd.f32 1.0, %v149_v31  ;;  %v60_v36 = vsel %vm59_vm0, %v57_v24, %v54_v30 }
  0x44   :  { %v89_v38 = vadd.f32 1.0, %v151_v34  ;;  %v69_v39 = vsel %vm68_vm1, %v66_v28, %v63_v32  ;;  %v70_v40 = vsub.f32 0.6931472, %v60_v36 }
  0x45   :  { %v90_v41 = vmul.f32 0.5, %v88_v35  ;;  %v71_v42 = vsub.f32 0.6931472, %v69_v39 }
  0x46   :  { %v91_v43 = vmul.f32 0.5, %v89_v38  ;;  %v78_v44 = vadd.f32 %v76_v33, %v70_v40 }
  0x47   :  { %v103_v45 = vadd.f32 %v90_v41, %v44_v20  ;;  %v79_v46 = vadd.f32 %v77_v37, %v71_v42  ;;  %v97_v48 = vmul.f32 %v90_v41, %v44_v20 }
  0x48   :  { %v104_v47 = vadd.f32 %v91_v43, %v45_v21  ;;  %v98_v49 = vmul.f32 %v91_v43, %v45_v21 }
  0x49   :  { %v93_v50 = vadd.f32 %v79_v46, %v78_v44 }
  0x4a   :  { %v105_v51 = vadd.f32 %v104_v47, %v103_v45  ;;  %v99_v52 = vadd.f32 %v98_v49, %v97_v48 }
  0x4b   :  { %112 = vadd.xlane.f32.xlu1 %v93_v50 }
  0x4c   :  { %118 = vadd.xlane.f32.xlu0 %v105_v51 }
  0x50   :  { %115 = vadd.xlane.f32.xlu0 %v99_v52 }
  0xd8   :  { %v113_v62 = vpop.xlane.xlu1 %112 }
  0xd9   :  { %v119_v53 = vpop.xlane.xlu0 %118 }
  0xda   :  { %v122_v54 = vadd.f32 1.0, %v119_v53 }
  0xdc   :  { %152 = vrcp.f32 %v122_v54 }
  0xdd   :  { %v116_v55 = vpop.xlane.xlu0 %115 }
  0xde   :  { %v120_v56 = vmul.f32 2.0, %v116_v55 }
  0xe0   :  { %v121_v58 = vadd.f32 1.0, %v120_v56 }
  0xe6   :  { %v153_v60 = vpop.eup %152 }
  0xe7   :  { %v124_v61 = vmul.f32 %v153_v60, %v121_v58 }
  0xe9   :  { %v125_v63 = vsub.f32 1.0, %v124_v61 }
  0xeb   :  { %v129_v0 = vsel %vm128_vm2, %v113_v62, %v125_v63 }
  0xec   :  { %131 = vst.msk [vmem:[%s248_s2] sm:$0xff] %vm130_vm3, %v129_v0 }
  0xed   :  { %136 = vsyncpa [#allocation6], 1 }
  0xee   :  { %137 = vsyncpa [#allocation8], 1 }

</bundles_post_ra>
